<compile_context>
chip_gen: v6e
topology: v6e:2x2x1
jax: 0.10.0
libtpu: 0.0.40
codegen_flags: <defaults>
</compile_context>

<pallas_src>
import functools
import math

import jax
import jax.numpy as jnp
from jax.experimental import pallas as pl
from jax.experimental.pallas import tpu as pltpu


def _sdpa_kernel(q_ref, k_ref, v_ref, *refs, return_score, matmul_dtype):
    # Block shapes (batch dim squeezed by BlockSpec):
    #   q_ref     : (H, TQ, M)    M == d_tensor (full contraction dim)
    #   k_ref     : (H, M,  TJ)   j tile of k's LAST dim (reference does q @ k untransposed)
    #   v_ref     : (H, TJ, D)
    #   out_ref   : (H, TQ, D)    accumulated over the j grid axis
    #   score_ref : (H, TQ, TJ)   only when return_score
    #   acc_ref   : (H, TQ, D)    f32 scratch accumulator
    if return_score:
        out_ref, score_ref, acc_ref = refs
    else:
        out_ref, acc_ref = refs
        score_ref = None

    ji = pl.program_id(2)

    @pl.when(ji == 0)
    def _():
        acc_ref[...] = jnp.zeros_like(acc_ref)

    d_tensor = q_ref.shape[-1]
    scale = 1.0 / math.sqrt(d_tensor)

    q = q_ref[...]
    k = k_ref[...]
    v = v_ref[...]

    mm_dtype = q.dtype if matmul_dtype is None else jnp.dtype(matmul_dtype)

    # Fold 1/sqrt(d) into q only when that multiply happens in f32; otherwise
    # scale the f32 score to keep numerics closest to the reference.
    scale_q = (q.dtype == jnp.float32) and (mm_dtype == jnp.float32)
    if scale_q:
        q = q * jnp.float32(scale)
    q = q.astype(mm_dtype)
    k = k.astype(mm_dtype)

    # Reference bug reproduced: q @ k with k UN-transposed (contraction over q's last
    # dim against k's sequence dim).  f32 accumulation on the MXU.
    score = jnp.einsum("him,hmj->hij", q, k, preferred_element_type=jnp.float32)
    if not scale_q:
        score = score * jnp.float32(scale)

    # nn.Softmax() default dim -> dim=1 of the 4-D tensor == the HEAD axis (axis 0 here).
    # All heads are resident in the block, so the reduction is complete; it is
    # elementwise in (i, j), hence independent per j tile (no online softmax needed).
    m = jnp.max(score, axis=0, keepdims=True)
    e = jnp.exp(score - m)
    s = jnp.sum(e, axis=0, keepdims=True)
    p = e * pl.reciprocal(s, approx=False)      # one reciprocal + H cheap multiplies

    # Single low-precision cast of p, reused by both the score store and the matmul.
    p_lo = p.astype(out_ref.dtype)
    if score_ref is not None:
        score_ref[...] = p_lo

    p_mm = p_lo if p_lo.dtype == mm_dtype else p.astype(mm_dtype)
    acc_ref[...] += jnp.einsum("hij,hjd->hid", p_mm, v.astype(mm_dtype),
                               preferred_element_type=jnp.float32)

    @pl.when(ji == pl.num_programs(2) - 1)
    def _():
        out_ref[...] = acc_ref[...].astype(out_ref.dtype)


def _vmem_budget():
    """(tile-sizing budget, vmem_limit_bytes cap), generation-aware."""
    vmem_bytes = None
    try:
        info = pltpu.get_tpu_info()
        vmem_bytes = int(getattr(info, "vmem_capacity_bytes", None))
    except Exception:  # unknown part / query unsupported -> stay v7x-safe
        vmem_bytes = None
    if vmem_bytes is not None and vmem_bytes >= (100 << 20):
        return 96 << 20, 100 << 20          # 128 MiB parts (v5e / v6e)
    return 40 << 20, 56 << 20               # 64 MiB parts (v7x) or unknown


def _choose_tj(d_tensor, j_tile):
    """Score-column (kv) tile: must divide d_tensor and be lane-aligned (x128) or full."""
    if j_tile is not None:
        assert d_tensor % j_tile == 0 and (j_tile % 128 == 0 or j_tile == d_tensor), (
            "j_tile must divide d_tensor and be a multiple of 128 (or the full dim)")
        return j_tile
    if d_tensor <= 512:
        return d_tensor
    for tj in (512, 384, 256, 128):
        if d_tensor % tj == 0:
            return tj
    return d_tensor   # no lane-aligned divisor -> keep full columns resident


def _pick_tiles(h, n_len, d_tensor, itemsize, return_score, q_tile, j_tile, budget):
    tj = _choose_tj(d_tensor, j_tile)

    def footprint(tq):
        q_b = h * tq * d_tensor * itemsize
        k_b = h * n_len * tj * itemsize
        v_b = h * tj * d_tensor * itemsize
        o_b = h * tq * d_tensor * itemsize
        s_b = h * tq * tj * itemsize if return_score else 0
        blocks = 2 * (q_b + k_b + v_b + o_b + s_b)                    # double-buffered pipeline
        acc = h * tq * d_tensor * 4                                   # f32 accumulator scratch
        interm = h * tq * tj * (3 * 4 + itemsize) + 2 * tq * tj * 4   # f32 softmax temporaries
        return blocks + acc + interm

    if q_tile is not None:
        assert q_tile == n_len or q_tile % 8 == 0, "q_tile must be sublane-aligned (x8) or full"
        tq = q_tile
    else:
        tq = n_len if n_len <= 1024 else 1024
        while footprint(tq) > budget and tq > 8:
            if tq > 256:
                tq = max(256, ((tq // 2) // 256) * 256)   # MXU-friendly multiples of 256
            else:
                tq = max(8, ((tq // 2) // 8) * 8)         # sublane-aligned fallback
    return tq, tj, footprint(tq)


@functools.partial(jax.jit,
                   static_argnames=("q_tile", "j_tile", "return_score", "matmul_dtype"))
def scale_dot_product_attention(q, k, v, mask=None, *, q_tile=None, j_tile=None,
                                return_score=True, matmul_dtype=None):
    """Pallas equivalent of ScaleDotProductAttention.forward (mask=None path).

    Returns (out, score) when return_score=True (matches the module), else just out.
    """
    # TODO(synk): mask branch not implemented (reference calls the nonexistent
    # Tensor.mask_fill; only the mask=None path is well defined).
    assert mask is None
    b, h, n_len, d_tensor = k.shape
    assert q.shape == (b, h, n_len, d_tensor)
    assert n_len == d_tensor, "reference does q @ k (untransposed): needs n_len == d_tensor"

    itemsize = jnp.dtype(q.dtype).itemsize
    budget, limit_cap = _vmem_budget()
    tq, tj, fp_bytes = _pick_tiles(h, n_len, d_tensor, itemsize,
                                   return_score, q_tile, j_tile, budget)
    grid = (b, pl.cdiv(n_len, tq), d_tensor // tj)

    # Leading batch dim squeezed (None) -> kernel sees 3-D blocks.
    q_spec = pl.BlockSpec((None, h, tq, d_tensor), lambda bi, qi, ji: (bi, 0, qi, 0))
    k_spec = pl.BlockSpec((None, h, n_len, tj), lambda bi, qi, ji: (bi, 0, 0, ji))
    v_spec = pl.BlockSpec((None, h, tj, d_tensor), lambda bi, qi, ji: (bi, 0, ji, 0))
    out_spec = pl.BlockSpec((None, h, tq, d_tensor), lambda bi, qi, ji: (bi, 0, qi, 0))
    score_spec = pl.BlockSpec((None, h, tq, tj), lambda bi, qi, ji: (bi, 0, qi, ji))

    out_shapes = [jax.ShapeDtypeStruct((b, h, n_len, d_tensor), q.dtype)]   # out = score @ v
    out_specs = [out_spec]
    if return_score:
        out_shapes.append(jax.ShapeDtypeStruct((b, h, n_len, d_tensor), q.dtype))  # softmax(score)
        out_specs.append(score_spec)

    vmem_limit_bytes = int(min(max(fp_bytes + (4 << 20), 32 << 20), limit_cap))

    n_out = 2 if return_score else 1
    cost = pl.CostEstimate(
        flops=4 * b * h * n_len * d_tensor * d_tensor,
        transcendentals=b * h * n_len * d_tensor,
        bytes_accessed=(3 + n_out) * b * h * n_len * d_tensor * itemsize,
    )

    kernel = functools.partial(_sdpa_kernel,
                               return_score=return_score, matmul_dtype=matmul_dtype)

    results = pl.pallas_call(
        kernel,
        out_shape=tuple(out_shapes),
        grid_spec=pltpu.PrefetchScalarGridSpec(
            num_scalar_prefetch=0,
            grid=grid,
            in_specs=[q_spec, k_spec, v_spec],
            out_specs=tuple(out_specs),
            scratch_shapes=[pltpu.VMEM((h, tq, d_tensor), jnp.float32)],
        ),
        compiler_params=pltpu.CompilerParams(
            # batch / q-tile axes are independent -> parallel (megacore-shardable);
            # the j (kv) axis carries the out accumulator -> arbitrary, last.
            dimension_semantics=("parallel", "parallel", "arbitrary"),
            vmem_limit_bytes=vmem_limit_bytes,
        ),
        cost_estimate=cost,
    )(q, k, v)

    if return_score:
        out, score = results
        return out, score
    return results[0] if isinstance(results, (list, tuple)) else results


def _reference(q, k, v):
    d_tensor = q.shape[-1]
    hi = jax.lax.Precision.HIGHEST
    score = jnp.einsum("bhim,bhmj->bhij", q, k, precision=hi) / math.sqrt(d_tensor)
    score = jax.nn.softmax(score, axis=1)  # nn.Softmax() implicit dim=1 for 4-D input
    out = jnp.einsum("bhij,bhjd->bhid", score, v, precision=hi)
    return out, score


if __name__ == "__main__":
    key = jax.random.PRNGKey(0)

    # Shape 1: (batch, n_head, n_len, d_tensor) with n_len == d_tensor (required by the
    # reference's `q @ k`). Single tile per batch.
    B, H, L, D = 2, 4, 8, 8
    kq, kk, kv, k2, k3 = jax.random.split(key, 5)
    q = jax.random.normal(kq, (B, H, L, D), dtype=jnp.float32)
    k = jax.random.normal(kk, (B, H, L, D), dtype=jnp.float32)
    v = jax.random.normal(kv, (B, H, L, D), dtype=jnp.float32)

    out, score = scale_dot_product_attention(q, k, v)
    jax.block_until_ready((out, score))
    ref_out, ref_score = _reference(q, k, v)
    assert jnp.allclose(out, ref_out, atol=1e-5, rtol=1e-5)
    assert jnp.allclose(score, ref_score, atol=1e-5, rtol=1e-5)

    # out-only path (score writeback dropped -> half the HBM write traffic).
    out_only = scale_dot_product_attention(q, k, v, return_score=False)
    jax.block_until_ready(out_only)
    assert jnp.allclose(out_only, ref_out, atol=1e-5, rtol=1e-5)

    # Shape 2: exercise the multi-q-tile grid path (2 q-tiles per batch, k/v reused).
    B2, H2, L2 = 2, 2, 16
    kq2, kk2, kv2 = jax.random.split(k2, 3)
    q2 = jax.random.normal(kq2, (B2, H2, L2, L2), dtype=jnp.float32)
    k2_ = jax.random.normal(kk2, (B2, H2, L2, L2), dtype=jnp.float32)
    v2 = jax.random.normal(kv2, (B2, H2, L2, L2), dtype=jnp.float32)

    out2, score2 = scale_dot_product_attention(q2, k2_, v2, q_tile=8)
    jax.block_until_ready((out2, score2))
    ref_out2, ref_score2 = _reference(q2, k2_, v2)
    assert jnp.allclose(out2, ref_out2, atol=1e-5, rtol=1e-5)
    assert jnp.allclose(score2, ref_score2, atol=1e-5, rtol=1e-5)

    # Shape 3: exercise the j-tiled (kv-column) accumulation path: grid (1, 2, 2).
    B3, H3, L3 = 1, 2, 256
    kq3, kk3, kv3 = jax.random.split(k3, 3)
    q3 = jax.random.normal(kq3, (B3, H3, L3, L3), dtype=jnp.float32)
    k3_ = jax.random.normal(kk3, (B3, H3, L3, L3), dtype=jnp.float32)
    v3 = jax.random.normal(kv3, (B3, H3, L3, L3), dtype=jnp.float32)

    out3, score3 = scale_dot_product_attention(q3, k3_, v3, q_tile=128, j_tile=128)
    jax.block_until_ready((out3, score3))
    ref_out3, ref_score3 = _reference(q3, k3_, v3)
    assert jnp.allclose(out3, ref_out3, atol=1e-3, rtol=1e-3)
    assert jnp.allclose(score3, ref_score3, atol=1e-3, rtol=1e-3)

    print("KERNEL_OK")
</pallas_src>

<mosaic_0001>
module attributes {stable_mosaic.version = 11 : i64} {
  func.func @_sdpa_kernel(%arg0: i32, %arg1: i32, %arg2: i32, %arg3: memref<1x4x8x8xf32, #tpu.memory_space<vmem>>, %arg4: memref<1x4x8x8xf32, #tpu.memory_space<vmem>>, %arg5: memref<1x4x8x8xf32, #tpu.memory_space<vmem>>, %arg6: memref<1x4x8x8xf32, #tpu.memory_space<vmem>>, %arg7: memref<1x4x8x8xf32, #tpu.memory_space<vmem>>, %arg8: memref<4x8x8xf32, #tpu.memory_space<vmem>>) attributes {dimension_semantics = [#tpu.dimension_semantics<parallel>, #tpu.dimension_semantics<parallel>, #tpu.dimension_semantics<arbitrary>], iteration_bounds = array<i64: 2, 1, 1>, scalar_prefetch = 0 : i64, scratch_operands = 1 : i64, tpu.core_type = #tpu.core_type<tc>, window_params = [{transform_indices = @transform_0, window_bounds = array<i64: 1, 4, 8, 8>}, {transform_indices = @transform_1, window_bounds = array<i64: 1, 4, 8, 8>}, {transform_indices = @transform_2, window_bounds = array<i64: 1, 4, 8, 8>}, {transform_indices = @transform_3, window_bounds = array<i64: 1, 4, 8, 8>}, {transform_indices = @transform_4, window_bounds = array<i64: 1, 4, 8, 8>}]} {
    %c0_i32 = arith.constant 0 : i32
    %0 = arith.cmpi eq, %arg2, %c0_i32 : i32
    %1 = arith.extui %0 : i1 to i32
    %c0_i32_0 = arith.constant 0 : i32
    %2 = arith.cmpi ne, %1, %c0_i32_0 : i32
    scf.if %2 {
      %cst_28 = arith.constant 0.000000e+00 : f32
      %32 = vector.broadcast %cst_28 : f32 to vector<4x8x8xf32>
      %c0_29 = arith.constant 0 : index
      %c0_30 = arith.constant 0 : index
      %c0_31 = arith.constant 0 : index
      %33 = vector.load %arg8[%c0_29, %c0_30, %c0_31] : memref<4x8x8xf32, #tpu.memory_space<vmem>>, vector<4x8x8xf32>
      tpu.vector_store %arg8[%c0_29, %c0_30, %c0_31], %32 {strides = array<i32>} : memref<4x8x8xf32, #tpu.memory_space<vmem>>, vector<4x8x8xf32>,
    } else {
    }
    %c0 = arith.constant 0 : index
    %c0_1 = arith.constant 0 : index
    %c0_2 = arith.constant 0 : index
    %c0_3 = arith.constant 0 : index
    %3 = vector.load %arg3[%c0, %c0_1, %c0_2, %c0_3] : memref<1x4x8x8xf32, #tpu.memory_space<vmem>>, vector<1x4x8x8xf32>
    %4 = vector.shape_cast %3 : vector<1x4x8x8xf32> to vector<4x8x8xf32>
    %c0_4 = arith.constant 0 : index
    %c0_5 = arith.constant 0 : index
    %c0_6 = arith.constant 0 : index
    %c0_7 = arith.constant 0 : index
    %5 = vector.load %arg4[%c0_4, %c0_5, %c0_6, %c0_7] : memref<1x4x8x8xf32, #tpu.memory_space<vmem>>, vector<1x4x8x8xf32>
    %6 = vector.shape_cast %5 : vector<1x4x8x8xf32> to vector<4x8x8xf32>
    %c0_8 = arith.constant 0 : index
    %c0_9 = arith.constant 0 : index
    %c0_10 = arith.constant 0 : index
    %c0_11 = arith.constant 0 : index
    %7 = vector.load %arg5[%c0_8, %c0_9, %c0_10, %c0_11] : memref<1x4x8x8xf32, #tpu.memory_space<vmem>>, vector<1x4x8x8xf32>
    %8 = vector.shape_cast %7 : vector<1x4x8x8xf32> to vector<4x8x8xf32>
    %cst = arith.constant 0.353553385 : f32
    %9 = vector.broadcast %cst : f32 to vector<4x8x8xf32>
    %10 = arith.mulf %4, %9 : vector<4x8x8xf32>
    "tpu.trace_start"() <{level = 10 : i32, message = "him,hmj->hij"}> : () -> ()
    %cst_12 = arith.constant dense<0.000000e+00> : vector<4x8x8xf32>
    %11 = tpu.matmul %10, %6, %cst_12 {dimension_numbers = #tpu.dot_dimension_numbers<[2], [1], [1], [2], [0, 0, 0, 1, 1, 2], [0], [0]>} : vector<4x8x8xf32>, vector<4x8x8xf32>, vector<4x8x8xf32> -> vector<4x8x8xf32>
    "tpu.trace_stop"() : () -> ()
    %cst_13 = arith.constant dense<0xFF800000> : vector<8x8xf32>
    %12 = vector.multi_reduction <maximumf>, %11, %cst_13 [0] : vector<4x8x8xf32> to vector<8x8xf32>
    %13 = vector.shape_cast %12 : vector<8x8xf32> to vector<1x8x8xf32>
    %14 = vector.broadcast %13 : vector<1x8x8xf32> to vector<4x8x8xf32>
    %15 = arith.subf %11, %14 : vector<4x8x8xf32>
    %16 = math.exp %15 : vector<4x8x8xf32>
    %cst_14 = arith.constant dense<0.000000e+00> : vector<8x8xf32>
    %17 = vector.multi_reduction <add>, %16, %cst_14 [0] : vector<4x8x8xf32> to vector<8x8xf32>
    %18 = vector.shape_cast %17 : vector<8x8xf32> to vector<1x8x8xf32>
    %19 = tpu.reciprocal %18 : vector<1x8x8xf32> -> vector<1x8x8xf32>
    %20 = vector.broadcast %19 : vector<1x8x8xf32> to vector<4x8x8xf32>
    %21 = arith.mulf %16, %20 : vector<4x8x8xf32>
    %c0_15 = arith.constant 0 : index
    %c0_16 = arith.constant 0 : index
    %c0_17 = arith.constant 0 : index
    %c0_18 = arith.constant 0 : index
    %22 = vector.load %arg7[%c0_15, %c0_16, %c0_17, %c0_18] : memref<1x4x8x8xf32, #tpu.memory_space<vmem>>, vector<1x4x8x8xf32>
    %23 = vector.shape_cast %22 : vector<1x4x8x8xf32> to vector<4x8x8xf32>
    %24 = vector.shape_cast %21 : vector<4x8x8xf32> to vector<1x4x8x8xf32>
    tpu.vector_store %arg7[%c0_15, %c0_16, %c0_17, %c0_18], %24 {strides = array<i32>} : memref<1x4x8x8xf32, #tpu.memory_space<vmem>>, vector<1x4x8x8xf32>,
    %c0_19 = arith.constant 0 : index
    %c0_20 = arith.constant 0 : index
    %c0_21 = arith.constant 0 : index
    %25 = vector.load %arg8[%c0_19, %c0_20, %c0_21] : memref<4x8x8xf32, #tpu.memory_space<vmem>>, vector<4x8x8xf32>
    "tpu.trace_start"() <{level = 10 : i32, message = "hij,hjd->hid"}> : () -> ()
    %cst_22 = arith.constant dense<0.000000e+00> : vector<4x8x8xf32>
    %26 = tpu.matmul %21, %8, %cst_22 {dimension_numbers = #tpu.dot_dimension_numbers<[2], [1], [1], [2], [0, 0, 0, 1, 1, 2], [0], [0]>} : vector<4x8x8xf32>, vector<4x8x8xf32>, vector<4x8x8xf32> -> vector<4x8x8xf32>
    "tpu.trace_stop"() : () -> ()
    %27 = arith.addf %25, %26 : vector<4x8x8xf32>
    %c0_23 = arith.constant 0 : index
    %c0_24 = arith.constant 0 : index
    %c0_25 = arith.constant 0 : index
    %28 = vector.load %arg8[%c0_23, %c0_24, %c0_25] : memref<4x8x8xf32, #tpu.memory_space<vmem>>, vector<4x8x8xf32>
    tpu.vector_store %arg8[%c0_23, %c0_24, %c0_25], %27 {strides = array<i32>} : memref<4x8x8xf32, #tpu.memory_space<vmem>>, vector<4x8x8xf32>,
    %c0_i32_26 = arith.constant 0 : i32
    %29 = arith.cmpi eq, %arg2, %c0_i32_26 : i32
    %30 = arith.extui %29 : i1 to i32
    %c0_i32_27 = arith.constant 0 : i32
    %31 = arith.cmpi ne, %30, %c0_i32_27 : i32
    scf.if %31 {
      %c0_28 = arith.constant 0 : index
      %c0_29 = arith.constant 0 : index
      %c0_30 = arith.constant 0 : index
      %32 = vector.load %arg8[%c0_28, %c0_29, %c0_30] : memref<4x8x8xf32, #tpu.memory_space<vmem>>, vector<4x8x8xf32>
      %c0_31 = arith.constant 0 : index
      %c0_32 = arith.constant 0 : index
      %c0_33 = arith.constant 0 : index
      %c0_34 = arith.constant 0 : index
      %33 = vector.load %arg6[%c0_31, %c0_32, %c0_33, %c0_34] : memref<1x4x8x8xf32, #tpu.memory_space<vmem>>, vector<1x4x8x8xf32>
      %34 = vector.shape_cast %33 : vector<1x4x8x8xf32> to vector<4x8x8xf32>
      %35 = vector.shape_cast %32 : vector<4x8x8xf32> to vector<1x4x8x8xf32>
      tpu.vector_store %arg6[%c0_31, %c0_32, %c0_33, %c0_34], %35 {strides = array<i32>} : memref<1x4x8x8xf32, #tpu.memory_space<vmem>>, vector<1x4x8x8xf32>,
    } else {
    }
    return
  }
  func.func @transform_0(%arg0: i32, %arg1: i32, %arg2: i32) -> (i32, i32, i32, i32) {
    %c0_i32 = arith.constant 0 : i32
    %c0_i32_0 = arith.constant 0 : i32
    %c0_i32_1 = arith.constant 0 : i32
    return %arg0, %c0_i32, %arg1, %c0_i32_0 : i32, i32, i32, i32
  }
  func.func @transform_1(%arg0: i32, %arg1: i32, %arg2: i32) -> (i32, i32, i32, i32) {
    %c0_i32 = arith.constant 0 : i32
    %c0_i32_0 = arith.constant 0 : i32
    %c0_i32_1 = arith.constant 0 : i32
    return %arg0, %c0_i32, %c0_i32_0, %arg2 : i32, i32, i32, i32
  }
  func.func @transform_2(%arg0: i32, %arg1: i32, %arg2: i32) -> (i32, i32, i32, i32) {
    %c0_i32 = arith.constant 0 : i32
    %c0_i32_0 = arith.constant 0 : i32
    %c0_i32_1 = arith.constant 0 : i32
    return %arg0, %c0_i32, %arg2, %c0_i32_0 : i32, i32, i32, i32
  }
  func.func @transform_3(%arg0: i32, %arg1: i32, %arg2: i32) -> (i32, i32, i32, i32) {
    %c0_i32 = arith.constant 0 : i32
    %c0_i32_0 = arith.constant 0 : i32
    %c0_i32_1 = arith.constant 0 : i32
    return %arg0, %c0_i32, %arg1, %c0_i32_0 : i32, i32, i32, i32
  }
  func.func @transform_4(%arg0: i32, %arg1: i32, %arg2: i32) -> (i32, i32, i32, i32) {
    %c0_i32 = arith.constant 0 : i32
    %c0_i32_0 = arith.constant 0 : i32
    return %arg0, %c0_i32, %arg1, %arg2 : i32, i32, i32, i32
  }
}

</mosaic_0001>

<bundles_post_ra>
// kernel: scale_dot_product_attention.1
= control target key start
LH: loop header
LB: loop body
LE: loop exit
PB: predicated region body
PF: predicated region fallthrough
CT: control target
= control target key end

     0   :  { %s1971_s0 = inlined_call_operand.hbm [shape: f32[2,4,8,8], index: 0, kind: input, shape index: {}]   ;;  %s1972_s1 = inlined_call_operand.hbm [shape: f32[2,4,8,8], index: 1, kind: input, shape index: {}]   ;;  %s1973_s2 = inlined_call_operand.hbm [shape: f32[2,4,8,8], index: 2, kind: input, shape index: {}]   ;;  %s1974_s3 = inlined_call_operand.hbm [shape: f32[2,4,8,8], index: 3, kind: output, shape index: {0}]   ;;  %s1975_s4 = inlined_call_operand.hbm [shape: f32[2,4,8,8], index: 4, kind: output, shape index: {1}]  }
   0x1   :  { %1982 = sst [smem:[#allocation20_spill]] %s1972_s1 }
   0x2   :  { %10 = vsyncpa [#allocation4], 0 }
   0x3   :  { %12 = vsyncpa [#allocation4 + $0x1], 0 }
   0x4   :  { %13 = vsyncpa [#allocation7], 0 }
   0x5   :  { %15 = vsyncpa [#allocation7 + $0x1], 0 }
   0x6   :  { %16 = vsyncpa [#allocation5], 0 }
   0x7   :  { %18 = vsyncpa [#allocation5 + $0x1], 0 }
   0x8   :  { %19 = vsyncpa [#allocation11], 0 }
   0x9   :  { %21 = vsyncpa [#allocation11 + $0x1], 0  ;;  %s1639_s15 = smov 0   ;;  %s1641_s16 = smov 0  }
   0xa   :  { %s1643_s17 = smov 0   ;;  %s1645_s18 = smov 0  }
   0xb   :  { %s1647_s19 = smov 0   ;;  %s1649_s20 = smov 0  }
   0xc LB: > { %1983 = sst [smem:[#allocation16_spill]] %s1597_s19  ;;  %s1670_s21 = sadd.s32 4294967295, %s1601_s20   ;;  %s1601_s20 = sphi %s1649_s20, %s27_s20   ;;  %s1597_s19 = sphi %s1647_s19, %s2000_s19   ;;  %s1593_s18 = sphi %s1645_s18, %s1999_s18   ;;  %s1589_s17 = sphi %s1643_s17, %s2003_s17   ;;  %s1585_s16 = sphi %s1641_s16, %s2002_s16   ;;  %s1581_s15 = sphi %s1639_s15, %s2001_s15  }
   0xd   : > { %s1215_s22 = sadd.s32 4294967294, %s1601_s20   ;;  %s46_s23 = sadd.s32 1, %s1597_s19 }
   0xe   : > { %s55_s24 = sadd.s32 1, %s1589_s17  ;;  %p48_p0 = scmp.ge.s32.totalorder %s46_s23, 2 }
   0xf   : > { %p62_p1 = scmp.ne.s32.totalorder %s1589_s17, %s1585_s16  ;;  %p63_p2 = scmp.eq.s32.totalorder %s1601_s20, 0 }
  0x10   : > { %p68_p3 = scmp.ne.s32.totalorder %s1585_s16, %s1581_s15  ;;  %s2005_s23 = smov (%p48_p0, %s46_s23), 0 }
  0x11   : > { %1984 = sst [smem:[#allocation17_spill]] %s2005_s23  ;;  %p1682_p4 = por %p63_p2, %p62_p1 }
  0x12   : > { %p69_p5 = scmp.eq.s32.totalorder %s1670_s21, 0  ;;  %s50_s26 = ssub.s32 %s1597_s19, %s2005_s23 }
  0x13   : > { %p150_p6 = scmp.eq.s32.totalorder %s1670_s21, 1  ;;  %p53_p7 = scmp.eq.s32.totalorder %s50_s26, 0 }
  0x14   : > { %p1690_p8 = por %p69_p5, %p68_p3  ;;  %p156_p10 = scmp.eq.s32.totalorder %s1215_s22, 1 }
  0x15   : > { %p1694_p9 = por %p150_p6, %p62_p1  ;;  %p1337_p13 = scmp.lt.s32.totalorder %s1601_s20, 2 }
  0x16   : > { %s1699_s29 = scalar_select %p53_p7, %s1589_s17, %s55_s24  }
  0x17   : > { %p1701_p11 = por %p156_p10, %p68_p3  ;;  %s1976_s5 = sand.u32 1, %s1589_s17  }
  0x18   : > { %1988 = sst [smem:[#allocation18_spill]] %s1699_s29  ;;  %s1710_s6 = sshll.u32 %s1976_s5, 5 }
  0x19   : > { %s1989_s30 = scalar_select %p1701_p11, 1, 0 }
  0x1a   : > { %s1713_s7 = sshll.u32 %s1597_s19, 9  ;;  %p1717_p0 = pnand %p1337_p13, %p1682_p4 }
  0x1b   : > { %1990 = sst [smem:[#allocation19_spill]] %s1989_s30  ;;  %s228_s9 = sand.u32 1, %s1601_s20  }
  0x1c   : > { %s1992_s1 = sld [smem:[#allocation20_spill]]  ;;  %s232_s13 = scalar_lea.vmem [#allocation6], %s1710_s6 }
  0x1d   : > { %s240_s14 = sshll.u32 %s232_s13, 4  ;;  %p1227_p1 = scmp.ge.s32.totalorder %s1601_s20, 1  ;;  %s241_s14 = int_to_ptr.vmem [resolvable:$true] %s240_s14 }
  0x1e   : > { %p270_p2 = scmp.lt.s32.totalorder %s1601_s20, 3  ;;  %s1729_s22 = scalar_lea.sflag [#allocation7], %s228_s9 }
  0x1f   : > { %p1405_p3 = pneg %p1717_p0  ;;  %s1416_s24 = scalar_lea.vmem %s241_s14, 512 }
  0x20   : > { %p1417_p4 = scmp.ne.s32.totalorder %s241_s14, %s1416_s24  ;;  %s1603_s25 = smov [#allocation6]  }
  0x21   : > { %s1421_s26 = sshll.u32 %s1603_s25, 4  ;;  %s1422_s26 = int_to_ptr.vmem [resolvable:$false] %s1421_s26 }
  0x22   : > { %s239_s12 = scalar_lea.hbm %s1992_s1, %s1713_s7  ;;  %p1419_p5 = pnand %p1417_p4, %p1405_p3 }
  0x23   : > { %s1423_s10 = scalar_lea.vmem %s1422_s26, 1024  ;;  %p1424_p7 = scmp.lt.s32.totalorder %s241_s14, %s1422_s26 }
  0x24   : > { %p1420_p6 = pneg %p1419_p5  ;;  %p1425_p10 = scmp.lt.s32.totalorder %s1423_s10, %s1416_s24 }
  0x26   : > { %p1426_p13 = por %p1425_p10, %p1424_p7 }
  0x28   : > { %p1427_p12 = pnand %p1426_p13, %p1420_p6 }
  0x2a   : > { %1430 = shalt.err (!%p1427_p12)
}
  0x2b   : > { %s1980_s11 = smov 128   ;;  %s1605_s9 = smov 8  }
  0x2c   : > { %1326 = dma.hbm_to_vmem [thread:$0]  (!%p1717_p0), %s239_s12, 512, %s241_s14, %s1729_s22, %s1980_s11, %s1980_s11, %s1605_s9  }
  0x2d   : > { %p1746_p4 = pnand %p1227_p1, %p270_p2  ;;  %s217_s26 = scalar_lea.hbm %s1971_s0, %s1713_s7 }
  0x2e   : > { %s210_s10 = scalar_lea.vmem [#allocation3], %s1710_s6  ;;  %s261_s19 = scalar_lea.hbm %s1973_s2, %s1713_s7 }
  0x2f   : > { %s218_s5 = sshll.u32 %s210_s10, 4  ;;  %s1994_s29 = sand.u32 1, %s1589_s17   ;;  %s219_s5 = int_to_ptr.vmem [resolvable:$true] %s218_s5 }
  0x30   : > { %s207_s30 = scalar_lea.sflag [#allocation4], %s1994_s29  ;;  %s1444_s12 = scalar_lea.vmem %s219_s5, 512 }
  0x31   : > { %p1445_p12 = scmp.ne.s32.totalorder %s219_s5, %s1444_s12  ;;  %s1606_s14 = smov [#allocation3]  }
  0x32   : > { %s1449_s11 = sshll.u32 %s1606_s14, 4  ;;  %s1450_s11 = int_to_ptr.vmem [resolvable:$false] %s1449_s11 }
  0x33   : > { %p1447_p1 = pnand %p1445_p12, %p1405_p3  ;;  %s1451_s24 = scalar_lea.vmem %s1450_s11, 1024 }
  0x34   : > { %p1452_p5 = scmp.lt.s32.totalorder %s219_s5, %s1450_s11  ;;  %p1453_p6 = scmp.lt.s32.totalorder %s1451_s24, %s1444_s12 }
  0x35   : > { %p1448_p2 = pneg %p1447_p1 }
  0x36   : > { %p1454_p7 = por %p1453_p6, %p1452_p5 }
  0x38   : > { %p1455_p10 = pnand %p1454_p7, %p1448_p2 }
  0x3a   : > { %1458 = shalt.err (!%p1455_p10)
}
  0x3b   : > { %s1995_s1 = smov 128   ;;  %s254_s23 = scalar_lea.vmem [#allocation8], %s1710_s6 }
  0x3c   : > { %1323 = dma.hbm_to_vmem [thread:$0]  (!%p1717_p0), %s217_s26, 512, %s219_s5, %s207_s30, %s1995_s1, %s1995_s1, %s1605_s9  }
  0x3d   : > { %s262_s29 = sshll.u32 %s254_s23, 4  ;;  %s1607_s11 = smov [#allocation8]   ;;  %s263_s29 = int_to_ptr.vmem [resolvable:$true] %s262_s29 }
  0x3e   : > { %s1472_s25 = scalar_lea.vmem %s263_s29, 512  ;;  %s1477_s10 = sshll.u32 %s1607_s11, 4  ;;  %s1478_s10 = int_to_ptr.vmem [resolvable:$false] %s1477_s10 }
  0x3f   : > { %p1473_p13 = scmp.ne.s32.totalorder %s263_s29, %s1472_s25  ;;  %s1479_s12 = scalar_lea.vmem %s1478_s10, 1024 }
  0x40   : > { %p1480_p2 = scmp.lt.s32.totalorder %s263_s29, %s1478_s10  ;;  %p1481_p5 = scmp.lt.s32.totalorder %s1479_s12, %s1472_s25 }
  0x41   : > { %p1475_p12 = pnand %p1473_p13, %p1405_p3 }
  0x42   : > { %p1482_p6 = por %p1481_p5, %p1480_p2 }
  0x43   : > { %p1476_p1 = pneg %p1475_p12 }
  0x45   : > { %p1483_p7 = pnand %p1482_p6, %p1476_p1 }
  0x47   : > { %1486 = shalt.err (!%p1483_p7)
}
  0x48   : > { %1329 = dma.hbm_to_vmem [thread:$0]  (!%p1717_p0), %s261_s19, 512, %s263_s29, %s1729_s22, %s1995_s1, %s1995_s1, %s1605_s9  }
  0x49   : > { %274 = sbr.rel (%p1746_p4) target bundleno = 551 (0x227), region = 32  ;;  %s1787_s6 = sand.u32 (!%p1746_p4), 1, %s1585_s16  }
  0x4a   : > { %s1790_s8 = sshll.u32 (!%p1746_p4), %s1787_s6, 5  ;;  %s277_s26 = scalar_lea.sflag (!%p1746_p4), [#allocation4], %s1787_s6 }
  0x4b   : > { %s1794_s14 = scalar_lea.vmem (!%p1746_p4), [#allocation3], %s1790_s8 }
  0x4e   : > { %1564 = dma.done.wait (%p1690_p8), %s277_s26, 512  }
  0x4f   : > { %1566 = vsyncadd (%p1690_p8), %s277_s26, 4294966784  ;;  %s285_s19 = sand.u32 1, %s1670_s21   ;;  %s289_s22 = scalar_lea.vmem [#allocation6], %s1790_s8 }
  0x50   : > { %s286_s7 = scalar_lea.sflag [#allocation7], %s285_s19 }
  0x51   : > { %1568 = dma.done.wait (%p1690_p8), %s286_s7, 1024  }
  0x52   : > { %1570 = vsyncadd (%p1690_p8), %s286_s7, 4294966272  ;;  %vm342_vm0 = vcmask 64512   ;;  %v1608_v0 = vmov 0.0   ;;  %vm1609_vm1 = vmmov 0   ;;  %v351_v1 = vld [vmem:[%s289_s22] sm:$0xff]  ;;  %v352_v2 = vld [vmem:[%s289_s22 + $0x8] sm:$0xff] }
  0x53   : > { %1270 = vmatprep.subr.mxu0 %v1608_v0  ;;  %1275 = vmatprep.subr.mxu1 %v1608_v0  ;;  %343 = vst.msk [vmem:[#allocation2] sm:$0xff] %vm342_vm0, %v1608_v0  ;;  %344 = vst.msk [vmem:[#allocation2 + $0x8] sm:$0xff] %vm342_vm0, %v1608_v0  ;;  %v347_v3 = vld [vmem:[%s1794_s14] sm:$0xff]  ;;  %v348_v5 = vld [vmem:[%s1794_s14 + $0x8] sm:$0xff]  ;;  %s1841_s21 = scalar_lea.vmem [#allocation8], %s1790_s8  ;;  %s337_s27 = scalar_lea.vmem [#allocation10], %s1790_s8 }
  0x54   : > { %345 = vst.msk [vmem:[#allocation2 + $0x10] sm:$0xff] %vm342_vm0, %v1608_v0  ;;  %346 = vst.msk [vmem:[#allocation2 + $0x18] sm:$0xff] %vm342_vm0, %v1608_v0  ;;  %1272 = vmatprep.mubr.msk.f32.mxu0 %vm1609_vm1, %v1608_v0  ;;  %1277 = vmatprep.mubr.msk.f32.mxu1 %vm1609_vm1, %v1608_v0  ;;  %v359_v4 = vmul.f32 0.35355338, %v347_v3  ;;  %v353_v6 = vld [vmem:[%s289_s22 + $0x10] sm:$0xff]  ;;  %v354_v8 = vld [vmem:[%s289_s22 + $0x18] sm:$0xff] }
  0x55   : > { %1271 = vmatpush3.msra.mxu0 %v351_v1  ;;  %1276 = vmatpush3.msra.mxu1 %v352_v2  ;;  %v360_v7 = vmul.f32 0.35355338, %v348_v5  ;;  %v349_v9 = vld [vmem:[%s1794_s14 + $0x10] sm:$0xff]  ;;  %v350_v10 = vld [vmem:[%s1794_s14 + $0x18] sm:$0xff]  ;;  %v355_v13 = vld [vmem:[%s1841_s21] sm:$0xff]  ;;  %s1252_s9 = sshll.u32 %s1593_s18, 9 }
  0x56   : > { %1280 = vmatprep.subr.mxu0 %v1608_v0  ;;  %1285 = vmatprep.subr.mxu1 %v1608_v0  ;;  %v361_v11 = vmul.f32 0.35355338, %v349_v9  ;;  %v362_v12 = vmul.f32 0.35355338, %v350_v10  ;;  %v356_v14 = vld [vmem:[%s1841_s21 + $0x8] sm:$0xff]  ;;  %v357_v52 = vld [vmem:[%s1841_s21 + $0x10] sm:$0xff]  ;;  %s1876_s1 = scalar_lea.hbm %s1975_s4, %s1252_s9 }
  0x57   : > { %1273 = vmatmul.mubr.msk.f32.vlgmr.msra.gmra.mxu0 %vm342_vm0, %v359_v4  ;;  %1278 = vmatmul.mubr.msk.f32.vlgmr.msra.gmra.mxu1 %vm342_vm0, %v360_v7  ;;  %v358_v53 = vld [vmem:[%s1841_s21 + $0x18] sm:$0xff]  ;;  %s1044_s23 = sshll.u32 %s337_s27, 4  ;;  %s1012_s29 = scalar_lea.sflag [#allocation11], %s1787_s6  ;;  %s1878_s23 = int_to_ptr.vmem [resolvable:$true] %s1044_s23 }
  0x58   : > { %1281 = vmatpush3.msra.mxu0 %v353_v6  ;;  %1286 = vmatpush3.msra.mxu1 %v354_v8  ;;  %s1487_s25 = scalar_lea.vmem %s1878_s23, 512  ;;  %s1610_s11 = smov [#allocation10]  }
  0x59   : > { %1282 = vmatprep.mubr.msk.f32.mxu0 %vm1609_vm1, %v1608_v0  ;;  %1287 = vmatprep.mubr.msk.f32.mxu1 %vm1609_vm1, %v1608_v0  ;;  %p1488_p8 = scmp.ne.s32.totalorder %s1878_s23, %s1487_s25  ;;  %s1491_s10 = sshll.u32 %s1610_s11, 4  ;;  %s1492_s10 = int_to_ptr.vmem [resolvable:$false] %s1491_s10 }
  0x5a   : > { %1290 = vmatprep.subr.mxu0 %v1608_v0  ;;  %1295 = vmatprep.subr.mxu1 %v1608_v0  ;;  %s1493_s12 = scalar_lea.vmem %s1492_s10, 1024  ;;  %p1494_p4 = scmp.lt.s32.totalorder %s1878_s23, %s1492_s10 }
  0x5b   : > { %1283 = vmatmul.mubr.msk.f32.vlgmr.msra.gmra.mxu0 %vm342_vm0, %v361_v11  ;;  %1288 = vmatmul.mubr.msk.f32.vlgmr.msra.gmra.mxu1 %vm342_vm0, %v362_v12  ;;  %p1489_p0 = pnand %p1488_p8, %p1694_p9  ;;  %p1495_p10 = scmp.lt.s32.totalorder %s1493_s12, %s1487_s25 }
  0x5c   : > { %1292 = vmatprep.mubr.msk.f32.mxu0 %vm1609_vm1, %v1608_v0  ;;  %1297 = vmatprep.mubr.msk.f32.mxu1 %vm1609_vm1, %v1608_v0 }
  0x5d   : > { %1291 = vmatpush3.msra.mxu0 %v355_v13  ;;  %1296 = vmatpush3.msra.mxu1 %v356_v14  ;;  %p1490_p3 = pneg %p1489_p0  ;;  %p1496_p13 = por %p1495_p10, %p1494_p4 }
  0x5e   : > { %1300 = vmatprep.subr.mxu0 %v1608_v0  ;;  %1305 = vmatprep.subr.mxu1 %v1608_v0 }
  0x5f   : > { %p1497_p12 = pnand %p1496_p13, %p1490_p3 }
 0x117   : > { %v433_v15 = vpop.f32.mrf.mxu0  ;;  %v506_v16 = vpop.f32.mrf.mxu1 }
 0x118   : > { %v656_v19 = vsel %vm342_vm0, %v433_v15, -inf  ;;  %v657_v20 = vsel %vm342_vm0, %v506_v16, -inf }
 0x119   : > { %v1274_v17 = vpop.f32.mrf.mxu0  ;;  %v1279_v18 = vpop.f32.mrf.mxu1  ;;  %v660_v26 = vmax.f32 %v656_v19, %v657_v20 }
 0x11b   : > { %v579_v21 = vpop.f32.mrf.mxu0  ;;  %v652_v23 = vpop.f32.mrf.mxu1 }
 0x11c   : > { %v658_v22 = vsel %vm342_vm0, %v579_v21, -inf  ;;  %v659_v24 = vsel %vm342_vm0, %v652_v23, -inf }
 0x11d   : > { %v1284_v25 = vpop.f32.mrf.mxu0  ;;  %v661_v27 = vmax.f32 %v658_v22, %v659_v24  ;;  %v1289_v28 = vpop.f32.mrf.mxu1 }
 0x11f   : > { %v662_v29 = vmax.f32 %v660_v26, %v661_v27 }
 0x121   : > { %v663_v30 = vsub.f32 %v433_v15, %v662_v29  ;;  %v664_v31 = vsub.f32 %v506_v16, %v662_v29  ;;  %v665_v32 = vsub.f32 %v579_v21, %v662_v29  ;;  %v666_v33 = vsub.f32 %v652_v23, %v662_v29 }
 0x123   : > { %v667_v34 = vmul.f32 1.442695, %v663_v30  ;;  %v669_v35 = vmul.f32 1.442695, %v664_v31  ;;  %v671_v36 = vmul.f32 1.442695, %v665_v32 }
 0x124   : > { %v673_v37 = vmul.f32 1.442695, %v666_v33 }
 0x125   : > { %1393 = vpow2.f32 %v667_v34 }
 0x126   : > { %1395 = vpow2.f32 %v669_v35 }
 0x127   : > { %1397 = vpow2.f32 %v671_v36 }
 0x128   : > { %1399 = vpow2.f32 %v673_v37 }
 0x132   : > { %v1394_v38 = vpop.eup %1393 }
 0x133   : > { %v1396_v39 = vpop.eup %1395  ;;  %v675_v40 = vsel %vm342_vm0, %v1394_v38, 0.0 }
 0x134   : > { %v1398_v41 = vpop.eup %1397  ;;  %v676_v42 = vsel %vm342_vm0, %v1396_v39, 0.0 }
 0x135   : > { %v1400_v43 = vpop.eup %1399  ;;  %v677_v44 = vadd.f32 %v676_v42, %v675_v40  ;;  %v678_v45 = vsel %vm342_vm0, %v1398_v41, 0.0 }
 0x136   : > { %v680_v47 = vsel %vm342_vm0, %v1400_v43, 0.0 }
 0x137   : > { %v679_v46 = vadd.f32 %v678_v45, %v677_v44 }
 0x139   : > { %v681_v48 = vadd.f32 %v680_v47, %v679_v46 }
 0x13b   : > { %1401 = vrcp.f32 %v681_v48 }
 0x148   : > { %v1402_v49 = vpop.eup %1401 }
 0x149   : > { %v683_v50 = vmul.f32 %v1402_v49, %v1394_v38  ;;  %v684_v51 = vmul.f32 %v1402_v49, %v1396_v39  ;;  %v685_v54 = vmul.f32 %v1402_v49, %v1398_v41  ;;  %v686_v55 = vmul.f32 %v1402_v49, %v1400_v43 }
 0x14b   : > { %687 = vst.msk [vmem:[%s337_s27] sm:$0xff] %vm342_vm0, %v683_v50  ;;  %1293 = vmatmul.mubr.msk.f32.vlgmr.msra.gmra.mxu0 %vm342_vm0, %v683_v50  ;;  %688 = vst.msk [vmem:[%s337_s27 + $0x8] sm:$0xff] %vm342_vm0, %v684_v51  ;;  %1298 = vmatmul.mubr.msk.f32.vlgmr.msra.gmra.mxu1 %vm342_vm0, %v684_v51 }
 0x14c   : > { %689 = vst.msk [vmem:[%s337_s27 + $0x10] sm:$0xff] %vm342_vm0, %v685_v54  ;;  %690 = vst.msk [vmem:[%s337_s27 + $0x18] sm:$0xff] %vm342_vm0, %v686_v55  ;;  %1301 = vmatpush3.msra.mxu0 %v357_v52  ;;  %1306 = vmatpush3.msra.mxu1 %v358_v53 }
 0x14d   : > { %1302 = vmatprep.mubr.msk.f32.mxu0 %vm1609_vm1, %v1608_v0  ;;  %1307 = vmatprep.mubr.msk.f32.mxu1 %vm1609_vm1, %v1608_v0 }
 0x14f   : > { %1303 = vmatmul.mubr.msk.f32.vlgmr.msra.gmra.mxu0 %vm342_vm0, %v685_v54  ;;  %1308 = vmatmul.mubr.msk.f32.vlgmr.msra.gmra.mxu1 %vm342_vm0, %v686_v55 }
 0x150   : > { %1500 = shalt.err (!%p1497_p12)
}
 0x151   : > { %s1501_s30 = scalar_lea.hbm %s1876_s1, 512  ;;  %s1505_s14 = scalar_lea.hbm %s1975_s4, 1024 }
 0x152   : > { %p1502_p1 = scmp.ne.s32.totalorder %s1876_s1, %s1501_s30  ;;  %p1506_p6 = scmp.lt.s32.totalorder %s1876_s1, %s1975_s4 }
 0x153   : > { %p1507_p7 = scmp.lt.s32.totalorder %s1505_s14, %s1501_s30 }
 0x154   : > { %p1503_p2 = pnand %p1502_p1, %p1694_p9 }
 0x155   : > { %p1508_p8 = por %p1507_p7, %p1506_p6 }
 0x156   : > { %p1504_p5 = pneg %p1503_p2 }
 0x158   : > { %p1509_p0 = pnand %p1508_p8, %p1504_p5 }
 0x15a   : > { %1512 = shalt.err (!%p1509_p0)
}
 0x15b   : > { %s1611_s22 = smov 128   ;;  %s1612_s21 = smov 8   ;;  %v691_v56 = vld [vmem:[#allocation2] sm:$0xff]  ;;  %v692_v57 = vld [vmem:[#allocation2 + $0x8] sm:$0xff]  ;;  %v693_v0 = vld [vmem:[#allocation2 + $0x10] sm:$0xff] }
 0x15c   : > { %1317 = dma.vmem_to_hbm [thread:$0]  (%p1694_p9), %s1878_s23, 512, %s1876_s1, %s1012_s29, %s1611_s22, %s1611_s22, %s1612_s21   ;;  %v694_v1 = vld [vmem:[#allocation2 + $0x18] sm:$0xff] }
 0x15d   : > { %s330_s27 = scalar_lea.vmem [#allocation9], %s1790_s8  ;;  %s1918_s23 = scalar_lea.hbm %s1974_s3, %s1252_s9 }
 0x15e   : > { %s1026_s13 = sshll.u32 %s330_s27, 4  ;;  %s1007_s8 = scalar_lea.sflag [#allocation5], %s1787_s6  ;;  %s1920_s13 = int_to_ptr.vmem [resolvable:$true] %s1026_s13 }
 0x15f   : > { %s1513_s29 = scalar_lea.vmem %s1920_s13, 512  ;;  %s1613_s18 = smov [#allocation9]  }
 0x160   : > { %p1514_p3 = scmp.ne.s32.totalorder %s1920_s13, %s1513_s29  ;;  %s1517_s9 = sshll.u32 %s1613_s18, 4  ;;  %s1518_s9 = int_to_ptr.vmem [resolvable:$false] %s1517_s9 }
 0x161   : > { %s1519_s25 = scalar_lea.vmem %s1518_s9, 1024  ;;  %p1520_p13 = scmp.lt.s32.totalorder %s1920_s13, %s1518_s9 }
 0x162   : > { %p1515_p4 = pnand %p1514_p3, %p1694_p9  ;;  %p1521_p12 = scmp.lt.s32.totalorder %s1519_s25, %s1513_s29 }
 0x164   : > { %p1516_p10 = pneg %p1515_p4  ;;  %p1522_p1 = por %p1521_p12, %p1520_p13 }
 0x166   : > { %p1523_p2 = pnand %p1522_p1, %p1516_p10 }
 0x20b   : > { %v764_v58 = vpop.f32.mrf.mxu0  ;;  %v837_v59 = vpop.f32.mrf.mxu1 }
 0x20c   : > { %v987_v60 = vadd.f32 %v764_v58, %v691_v56  ;;  %v988_v61 = vadd.f32 %v837_v59, %v692_v57 }
 0x20d   : > { %v1294_v62 = vpop.f32.mrf.mxu0  ;;  %v1299_v63 = vpop.f32.mrf.mxu1 }
 0x20e   : > { %991 = vst.msk [vmem:[#allocation2] sm:$0xff] %vm342_vm0, %v987_v60  ;;  %992 = vst.msk [vmem:[#allocation2 + $0x8] sm:$0xff] %vm342_vm0, %v988_v61 }
 0x20f   : > { %v910_v2 = vpop.f32.mrf.mxu0  ;;  %v983_v3 = vpop.f32.mrf.mxu1 }
 0x210   : > { %v989_v4 = vadd.f32 %v910_v2, %v693_v0  ;;  %v990_v5 = vadd.f32 %v983_v3, %v694_v1 }
 0x211   : > { %v1304_v6 = vpop.f32.mrf.mxu0  ;;  %v1309_v7 = vpop.f32.mrf.mxu1 }
 0x212   : > { %993 = vst.msk [vmem:[#allocation2 + $0x10] sm:$0xff] %vm342_vm0, %v989_v4  ;;  %994 = vst.msk [vmem:[#allocation2 + $0x18] sm:$0xff] %vm342_vm0, %v990_v5 }
 0x215   : > { %v998_v8 = vld [vmem:[#allocation2] sm:$0xff]  ;;  %v999_v9 = vld [vmem:[#allocation2 + $0x8] sm:$0xff] }
 0x216   : > { %1002 = vst.msk [vmem:[%s330_s27] sm:$0xff] %vm342_vm0, %v998_v8  ;;  %1003 = vst.msk [vmem:[%s330_s27 + $0x8] sm:$0xff] %vm342_vm0, %v999_v9 }
 0x219   : > { %v1000_v10 = vld [vmem:[#allocation2 + $0x10] sm:$0xff]  ;;  %v1001_v11 = vld [vmem:[#allocation2 + $0x18] sm:$0xff] }
 0x21a   : > { %1004 = vst.msk [vmem:[%s330_s27 + $0x10] sm:$0xff] %vm342_vm0, %v1000_v10  ;;  %1005 = vst.msk [vmem:[%s330_s27 + $0x18] sm:$0xff] %vm342_vm0, %v1001_v11 }
 0x21b   : > { %1526 = shalt.err (!%p1523_p2)
}
 0x21c   : > { %s1527_s11 = scalar_lea.hbm %s1918_s23, 512  ;;  %s1531_s12 = scalar_lea.hbm %s1974_s3, 1024 }
 0x21d   : > { %p1528_p5 = scmp.ne.s32.totalorder %s1918_s23, %s1527_s11  ;;  %p1532_p8 = scmp.lt.s32.totalorder %s1918_s23, %s1974_s3 }
 0x21e   : > { %p1533_p0 = scmp.lt.s32.totalorder %s1531_s12, %s1527_s11 }
 0x21f   : > { %p1529_p6 = pnand %p1528_p5, %p1694_p9 }
 0x220   : > { %p1534_p3 = por %p1533_p0, %p1532_p8 }
 0x221   : > { %p1530_p7 = pneg %p1529_p6 }
 0x223   : > { %p1535_p4 = pnand %p1534_p3, %p1530_p7 }
 0x225   : > { %1538 = shalt.err (!%p1535_p4)
}
 0x226   : > { %1316 = dma.vmem_to_hbm [thread:$0]  (%p1694_p9), %s1920_s13, 512, %s1918_s23, %s1007_s8, %s1611_s22, %s1611_s22, %s1612_s21  }
 0x227 PF: > { %s1059_s14 = sand.u32 1, %s1581_s15   ;;  %p1997_p10 = scmp.ge.s32.totalorder %s1601_s20, 2 }
 0x228   : > { %s1060_s19 = scalar_lea.sflag [#allocation5], %s1059_s14 }
 0x229   : > { %p1331_p13 = pnand %p1997_p10, %p1701_p11 }
 0x22b   : > { %p1332_p12 = pneg %p1331_p13 }
 0x22d   : > { %1572 = dma.done.wait (%p1332_p12), %s1060_s19, 512  }
 0x22e   : > { %1574 = vsyncadd (%p1332_p12), %s1060_s19, 4294966784  ;;  %s1069_s7 = scalar_lea.sflag [#allocation11], %s1059_s14 }
 0x22f   : > { %1576 = dma.done.wait (%p1332_p12), %s1069_s7, 512  }
 0x230   : > { %1578 = vsyncadd (%p1332_p12), %s1069_s7, 4294966784  ;;  %s27_s20 = sadd.s32 1, %s1601_s20   ;;  %s1998_s28 = sld [smem:[#allocation18_spill]] }
 0x231   : > { %p24_p1 = scmp.ge.s32.totalorder %s27_s20, 4   ;;  %s1999_s18 = sld [smem:[#allocation16_spill]] }
 0x232   : > { %s2000_s19 = sld [smem:[#allocation17_spill]]  ;;  %s2001_s15 = smov %s1585_s16 }
 0x233   : > { %s2002_s16 = smov %s1589_s17  ;;  %26 = sbr.rel (!%p24_p1) target bundleno = 12 (0xc), region = 126 }
 0x236   : > { %s2003_s17 = smov %s1998_s28 }
 0x238   :  { %1074 = vsyncpa [#allocation4], 1 }
 0x239   :  { %1076 = vsyncpa [#allocation4 + $0x1], 1 }
 0x23a   :  { %1077 = vsyncpa [#allocation7], 1 }
 0x23b   :  { %1079 = vsyncpa [#allocation7 + $0x1], 1 }
 0x23c   :  { %1080 = vsyncpa [#allocation5], 1 }
 0x23d   :  { %1082 = vsyncpa [#allocation5 + $0x1], 1 }
 0x23e   :  { %1083 = vsyncpa [#allocation11], 1 }
 0x23f   :  { %1085 = vsyncpa [#allocation11 + $0x1], 1 }

</bundles_post_ra>
